<compile_context>
chip_gen: v7x
topology: tpu7x:2x2x1
jax: 0.10.0
libtpu: 0.0.40
codegen_flags: <defaults>
</compile_context>

<pallas_src>
import functools

import jax
import jax.numpy as jnp
from jax.experimental import pallas as pl
from jax.experimental.pallas import tpu as pltpu


def _round_up(x, m):
    return (x + m - 1) // m * m


# Column layout of the per-output-row constant table (shape (Nr, 8), f32).
_RC_BIAS, _RC_SELX, _RC_SELY, _RC_MWH, _RC_ANC = 0, 1, 2, 3, 4


def _detect_level_kernel(x_ref, w_ref, rc_ref, gxy_ref, raw_ref, dec_ref, *,
                         stride):
    """One (batch, spatial-tile) step of one detection level.

    x_ref   : (1, Cp, t_sp)   activations, native NCHW flattened (channels x HW)
    w_ref   : (Nr, Cp)        1x1-conv weight (constant block -> DMA elided)
    rc_ref  : (Nr, 8)         per-row constants [bias, sel_x, sel_y, m_wh, anchor]
    gxy_ref : (2, t_sp)       precomputed f32 grid coords [gx; gy] for this tile
    raw_ref : (1, Nr, t_sp)   conv output (PyTorch x[i], pre-permute)
    dec_ref : (1, Nr, t_sp)   decoded output (PyTorch z contribution)
    """
    x = x_ref[0]                                           # (Cp, t_sp)

    # 1x1 conv == channel matmul on the MXU, f32 accumulation.
    acc = jnp.dot(w_ref[...], x, preferred_element_type=jnp.float32)

    rc = rc_ref[...]                                       # (Nr, 8)
    bias = rc[:, _RC_BIAS:_RC_BIAS + 1]                    # (Nr, 1)
    sel_x = rc[:, _RC_SELX:_RC_SELX + 1]
    sel_y = rc[:, _RC_SELY:_RC_SELY + 1]
    m_wh = rc[:, _RC_MWH:_RC_MWH + 1]
    anc = rc[:, _RC_ANC:_RC_ANC + 1]

    acc = acc + bias
    raw_ref[0] = acc.astype(raw_ref.dtype)

    # Fused inference decode (sigmoid + grid/anchor transform).
    gxy = gxy_ref[...]                                     # (2, t_sp)
    gx = gxy[0:1, :]                                       # (1, t_sp)
    gy = gxy[1:2, :]

    sig = jax.nn.sigmoid(acc)
    s2 = sig * 2.0
    grid_term = sel_x * gx + sel_y * gy                    # (Nr, t_sp)
    xy = (s2 - 0.5 + grid_term) * stride
    wh = (s2 * s2) * anc
    m_xy = sel_x + sel_y                                   # (Nr, 1), exact 0/1
    dec = jnp.where(m_xy > 0.5, xy, jnp.where(m_wh > 0.5, wh, sig))
    dec_ref[0] = dec.astype(dec_ref.dtype)


def detect_forward_pallas(xs, weights, biases, anchors, strides, na, no,
                          use_bf16_matmul=False, store_dtype=jnp.float32,
                          spatial_tile=512):
    """Inference branch of Detect.forward: returns (cat(z, 1), [x_i...]).

    use_bf16_matmul : cast x / W to bf16 (f32 accumulation) — v6e/v7x option.
    store_dtype     : dtype of the two HBM outputs (bf16 halves v5e vst/HBM
                      write traffic; keep f32 when checking vs f32 reference).
    spatial_tile    : lane-tile over the flattened spatial dim (multiple of 128).
    """
    nl = len(xs)
    bs = int(xs[0].shape[0])
    N = na * no
    Nr = _round_up(N, 8)                         # sublane-align the small row dim
    in_dtype = jnp.bfloat16 if use_bf16_matmul else jnp.float32

    z_out, x_out = [], []
    for l in range(nl):
        _, C, ny, nx = (int(d) for d in xs[l].shape)
        HW = ny * nx
        t_sp = min(spatial_tile, _round_up(HW, 128))       # lane-dense tile
        HWpad = _round_up(HW, t_sp)
        Cp = _round_up(C, 8)                               # no-op at prod widths

        # NCHW -> (bs, C, HW) is a free reshape; no transpose, no Cmax pad.
        x3 = xs[l].reshape(bs, C, HW)
        if Cp != C or HWpad != HW:
            x3 = jnp.pad(x3, ((0, 0), (0, Cp - C), (0, HWpad - HW)))
        x3 = x3.astype(in_dtype)

        W = weights[l][:, :, 0, 0]                          # (N, C)
        W = jnp.pad(W, ((0, Nr - N), (0, Cp - C))).astype(in_dtype)

        # Per-output-row constants (channel n = a*no + c), precomputed host-side
        # so the kernel never does per-tile column classification.
        n_idx = jnp.arange(Nr)
        c_idx = n_idx % no
        a_idx = jnp.minimum(n_idx // no, na - 1)            # clamp padded rows
        bias = jnp.pad(biases[l].astype(jnp.float32), (0, Nr - N))
        sel_x = (c_idx == 0).astype(jnp.float32)
        sel_y = (c_idx == 1).astype(jnp.float32)
        m_wh = jnp.logical_or(c_idx == 2, c_idx == 3).astype(jnp.float32)
        anc = jnp.where(c_idx == 2, anchors[l][a_idx, 0],
                        jnp.where(c_idx == 3, anchors[l][a_idx, 1], 0.0))
        rowc = jnp.stack([bias, sel_x, sel_y, m_wh,
                          anc.astype(jnp.float32)], axis=1)
        rowc = jnp.pad(rowc, ((0, 0), (0, 8 - rowc.shape[1])))   # (Nr, 8)

        # Exact integer-derived grid coordinates (no f32 division in-kernel).
        hw = jnp.arange(HWpad, dtype=jnp.int32)
        gxy = jnp.stack([(hw % nx).astype(jnp.float32),
                         (hw // nx).astype(jnp.float32)], axis=0)  # (2, HWpad)

        kernel = functools.partial(_detect_level_kernel,
                                   stride=float(strides[l]))
        n_sp = HWpad // t_sp
        raw, dec = pl.pallas_call(
            kernel,
            out_shape=(jax.ShapeDtypeStruct((bs, Nr, HWpad), store_dtype),
                       jax.ShapeDtypeStruct((bs, Nr, HWpad), store_dtype)),
            grid=(bs, n_sp),
            in_specs=[
                pl.BlockSpec((1, Cp, t_sp), lambda b, j: (b, 0, j)),   # x
                pl.BlockSpec((Nr, Cp), lambda b, j: (0, 0)),           # W
                pl.BlockSpec((Nr, 8), lambda b, j: (0, 0)),            # row consts
                pl.BlockSpec((2, t_sp), lambda b, j: (0, j)),          # gx/gy
            ],
            out_specs=(
                pl.BlockSpec((1, Nr, t_sp), lambda b, j: (b, 0, j)),   # raw
                pl.BlockSpec((1, Nr, t_sp), lambda b, j: (b, 0, j)),   # decoded
            ),
            compiler_params=pltpu.CompilerParams(
                dimension_semantics=("parallel", "parallel"),
                vmem_limit_bytes=48 * 1024 * 1024),
        )(x3, W, rowc, gxy)

        # Back to PyTorch layouts (drop row/column padding first).
        raw = raw[:, :N, :HW].astype(jnp.float32)
        dec = dec[:, :N, :HW].astype(jnp.float32)
        raw5 = raw.reshape(bs, na, no, ny, nx).transpose(0, 1, 3, 4, 2)
        z = (dec.reshape(bs, na, no, ny, nx)
                .transpose(0, 1, 3, 4, 2)
                .reshape(bs, na * ny * nx, no))
        x_out.append(raw5)
        z_out.append(z)
    return jnp.concatenate(z_out, axis=1), x_out


def detect_forward_ref(xs, weights, biases, anchors, strides, na, no):
    """Pure-JAX reference replicating the PyTorch forward (inference mode)."""
    z_all, x_out = [], []
    for i, x in enumerate(xs):
        bs, C, ny, nx = x.shape
        w = weights[i][:, :, 0, 0]                                   # (N, C)
        conv = jnp.einsum("bchw,nc->bnhw", x, w) + biases[i][None, :, None, None]
        xi = conv.reshape(bs, na, no, ny, nx).transpose(0, 1, 3, 4, 2)
        x_out.append(xi)
        gy, gx = jnp.meshgrid(jnp.arange(ny), jnp.arange(nx), indexing="ij")
        grid = jnp.stack((gx, gy), axis=2).reshape(1, 1, ny, nx, 2).astype(jnp.float32)
        y = jax.nn.sigmoid(xi)
        xy = (y[..., 0:2] * 2 - 0.5 + grid) * strides[i]
        wh = (y[..., 2:4] * 2) ** 2 * anchors[i].reshape(1, na, 1, 1, 2)
        y = jnp.concatenate([xy, wh, y[..., 4:]], axis=-1)
        z_all.append(y.reshape(bs, -1, no))
    return jnp.concatenate(z_all, axis=1), x_out


if __name__ == "__main__":
    key = jax.random.PRNGKey(0)

    # Detect(nc=1, anchors=3-level YOLO anchors, ch=(4, 8, 16))
    nc = 1
    angle = 1
    no = nc + 5 + angle          # = 7
    anchors_list = [[10, 13, 16, 30, 33, 23],
                    [30, 61, 62, 45, 59, 119],
                    [116, 90, 156, 198, 373, 326]]
    nl = len(anchors_list)
    na = len(anchors_list[0]) // 2
    anchors = jnp.asarray(anchors_list, dtype=jnp.float32).reshape(nl, na, 2)
    strides = [8.0, 16.0, 32.0]
    ch = (4, 8, 16)
    bs = 2
    spatial = [(8, 8), (4, 4), (2, 2)]   # img 64x64 -> /8, /16, /32

    # Deterministic parameter init (shapes from nn.Conv2d(ch[i], no*na, 1)).
    weights, biases, xs = [], [], []
    for i in range(nl):
        k1, k2, k3, key = jax.random.split(key, 4)
        weights.append(0.1 * jax.random.normal(k1, (no * na, ch[i], 1, 1),
                                               dtype=jnp.float32))
        biases.append(0.05 * jax.random.normal(k2, (no * na,), dtype=jnp.float32))
        ny, nx = spatial[i]
        xs.append(jax.random.normal(k3, (bs, ch[i], ny, nx), dtype=jnp.float32))

    z, x_out = detect_forward_pallas(xs, weights, biases, anchors, strides, na, no)
    z = jax.block_until_ready(z)
    x_out = [jax.block_until_ready(t) for t in x_out]

    z_ref, x_ref = detect_forward_ref(xs, weights, biases, anchors, strides, na, no)
    assert z.shape == z_ref.shape
    assert jnp.allclose(z, z_ref, atol=1e-4, rtol=1e-4)
    for a, b in zip(x_out, x_ref):
        assert a.shape == b.shape
        assert jnp.allclose(a, b, atol=1e-4, rtol=1e-4)

    print("KERNEL_OK")
</pallas_src>

<mosaic_0001>
module attributes {stable_mosaic.version = 11 : i64} {
  func.func @_detect_level_kernel(%arg0: i32, %arg1: i32, %arg2: memref<1x8x128xf32, #tpu.memory_space<vmem>>, %arg3: memref<24x8xf32, #tpu.memory_space<vmem>>, %arg4: memref<24x8xf32, #tpu.memory_space<vmem>>, %arg5: memref<2x128xf32, #tpu.memory_space<vmem>>, %arg6: memref<1x24x128xf32, #tpu.memory_space<vmem>>, %arg7: memref<1x24x128xf32, #tpu.memory_space<vmem>>) attributes {dimension_semantics = [#tpu.dimension_semantics<parallel>, #tpu.dimension_semantics<parallel>], iteration_bounds = array<i64: 2, 1>, scalar_prefetch = 0 : i64, scratch_operands = 0 : i64, tpu.core_type = #tpu.core_type<tc>, window_params = [{transform_indices = @transform_0, window_bounds = array<i64: 1, 8, 128>}, {pipeline_mode = #tpu.pipeline_mode<synchronous>, transform_indices = @transform_1, window_bounds = array<i64: 24, 8>}, {pipeline_mode = #tpu.pipeline_mode<synchronous>, transform_indices = @transform_2, window_bounds = array<i64: 24, 8>}, {transform_indices = @transform_3, window_bounds = array<i64: 2, 128>}, {transform_indices = @transform_4, window_bounds = array<i64: 1, 24, 128>}, {transform_indices = @transform_5, window_bounds = array<i64: 1, 24, 128>}]} {
    %c0 = arith.constant 0 : index
    %c0_0 = arith.constant 0 : index
    %c0_1 = arith.constant 0 : index
    %0 = vector.load %arg2[%c0, %c0_0, %c0_1] : memref<1x8x128xf32, #tpu.memory_space<vmem>>, vector<1x8x128xf32>
    %1 = vector.shape_cast %0 : vector<1x8x128xf32> to vector<8x128xf32>
    %c0_2 = arith.constant 0 : index
    %c0_3 = arith.constant 0 : index
    %2 = vector.load %arg3[%c0_2, %c0_3] : memref<24x8xf32, #tpu.memory_space<vmem>>, vector<24x8xf32>
    %cst = arith.constant dense<0.000000e+00> : vector<24x128xf32>
    %3 = tpu.matmul %2, %1, %cst {dimension_numbers = #tpu.dot_dimension_numbers<[1], [0], [0], [1], [0, 0, 1, 1], [], []>} : vector<24x8xf32>, vector<8x128xf32>, vector<24x128xf32> -> vector<24x128xf32>
    %c0_4 = arith.constant 0 : index
    %c0_5 = arith.constant 0 : index
    %4 = vector.load %arg4[%c0_4, %c0_5] : memref<24x8xf32, #tpu.memory_space<vmem>>, vector<24x8xf32>
    %5 = vector.extract_strided_slice %4 {offsets = [0, 0], sizes = [24, 1], strides = [1, 1]} : vector<24x8xf32> to vector<24x1xf32>
    %6 = vector.extract_strided_slice %4 {offsets = [0, 1], sizes = [24, 1], strides = [1, 1]} : vector<24x8xf32> to vector<24x1xf32>
    %7 = vector.extract_strided_slice %4 {offsets = [0, 2], sizes = [24, 1], strides = [1, 1]} : vector<24x8xf32> to vector<24x1xf32>
    %8 = vector.extract_strided_slice %4 {offsets = [0, 3], sizes = [24, 1], strides = [1, 1]} : vector<24x8xf32> to vector<24x1xf32>
    %9 = vector.extract_strided_slice %4 {offsets = [0, 4], sizes = [24, 1], strides = [1, 1]} : vector<24x8xf32> to vector<24x1xf32>
    %10 = vector.broadcast %5 : vector<24x1xf32> to vector<24x128xf32>
    %11 = arith.addf %3, %10 : vector<24x128xf32>
    %c0_6 = arith.constant 0 : index
    %c0_7 = arith.constant 0 : index
    %c0_8 = arith.constant 0 : index
    %12 = vector.load %arg6[%c0_6, %c0_7, %c0_8] : memref<1x24x128xf32, #tpu.memory_space<vmem>>, vector<1x24x128xf32>
    %13 = vector.shape_cast %12 : vector<1x24x128xf32> to vector<24x128xf32>
    %14 = vector.shape_cast %11 : vector<24x128xf32> to vector<1x24x128xf32>
    tpu.vector_store %arg6[%c0_6, %c0_7, %c0_8], %14 {strides = array<i32>} : memref<1x24x128xf32, #tpu.memory_space<vmem>>, vector<1x24x128xf32>,
    %c0_9 = arith.constant 0 : index
    %c0_10 = arith.constant 0 : index
    %15 = vector.load %arg5[%c0_9, %c0_10] : memref<2x128xf32, #tpu.memory_space<vmem>>, vector<2x128xf32>
    %16 = vector.extract_strided_slice %15 {offsets = [0, 0], sizes = [1, 128], strides = [1, 1]} : vector<2x128xf32> to vector<1x128xf32>
    %17 = vector.extract_strided_slice %15 {offsets = [1, 0], sizes = [1, 128], strides = [1, 1]} : vector<2x128xf32> to vector<1x128xf32>
    %18 = arith.negf %11 : vector<24x128xf32>
    %19 = math.exp %18 : vector<24x128xf32>
    %cst_11 = arith.constant 1.000000e+00 : f32
    %20 = vector.broadcast %cst_11 : f32 to vector<24x128xf32>
    %21 = arith.addf %20, %19 : vector<24x128xf32>
    %22 = arith.divf %20, %21 : vector<24x128xf32>
    %cst_12 = arith.constant 2.000000e+00 : f32
    %23 = vector.broadcast %cst_12 : f32 to vector<24x128xf32>
    %24 = arith.mulf %22, %23 : vector<24x128xf32>
    %25 = vector.broadcast %6 : vector<24x1xf32> to vector<24x128xf32>
    %26 = vector.broadcast %16 : vector<1x128xf32> to vector<24x128xf32>
    %27 = arith.mulf %25, %26 : vector<24x128xf32>
    %28 = vector.broadcast %7 : vector<24x1xf32> to vector<24x128xf32>
    %29 = vector.broadcast %17 : vector<1x128xf32> to vector<24x128xf32>
    %30 = arith.mulf %28, %29 : vector<24x128xf32>
    %31 = arith.addf %27, %30 : vector<24x128xf32>
    %cst_13 = arith.constant 5.000000e-01 : f32
    %32 = vector.broadcast %cst_13 : f32 to vector<24x128xf32>
    %33 = arith.subf %24, %32 : vector<24x128xf32>
    %34 = arith.addf %33, %31 : vector<24x128xf32>
    %cst_14 = arith.constant 8.000000e+00 : f32
    %35 = vector.broadcast %cst_14 : f32 to vector<24x128xf32>
    %36 = arith.mulf %34, %35 : vector<24x128xf32>
    %37 = arith.mulf %24, %24 : vector<24x128xf32>
    %38 = vector.broadcast %9 : vector<24x1xf32> to vector<24x128xf32>
    %39 = arith.mulf %37, %38 : vector<24x128xf32>
    %40 = arith.addf %6, %7 : vector<24x1xf32>
    %cst_15 = arith.constant 5.000000e-01 : f32
    %41 = vector.broadcast %cst_15 : f32 to vector<24x1xf32>
    %42 = arith.cmpf ogt, %40, %41 : vector<24x1xf32>
    %cst_16 = arith.constant 5.000000e-01 : f32
    %43 = vector.broadcast %cst_16 : f32 to vector<24x1xf32>
    %44 = arith.cmpf ogt, %8, %43 : vector<24x1xf32>
    %45 = vector.shape_cast %44 : vector<24x1xi1> to vector<24x1xi1>
    %46 = vector.broadcast %45 : vector<24x1xi1> to vector<24x128xi1>
    %47 = arith.select %46, %39, %22 : vector<24x128xi1>, vector<24x128xf32>
    %48 = vector.shape_cast %42 : vector<24x1xi1> to vector<24x1xi1>
    %49 = vector.broadcast %48 : vector<24x1xi1> to vector<24x128xi1>
    %50 = arith.select %49, %36, %47 : vector<24x128xi1>, vector<24x128xf32>
    %c0_17 = arith.constant 0 : index
    %c0_18 = arith.constant 0 : index
    %c0_19 = arith.constant 0 : index
    %51 = vector.load %arg7[%c0_17, %c0_18, %c0_19] : memref<1x24x128xf32, #tpu.memory_space<vmem>>, vector<1x24x128xf32>
    %52 = vector.shape_cast %51 : vector<1x24x128xf32> to vector<24x128xf32>
    %53 = vector.shape_cast %50 : vector<24x128xf32> to vector<1x24x128xf32>
    tpu.vector_store %arg7[%c0_17, %c0_18, %c0_19], %53 {strides = array<i32>} : memref<1x24x128xf32, #tpu.memory_space<vmem>>, vector<1x24x128xf32>,
    return
  }
  func.func @transform_0(%arg0: i32, %arg1: i32) -> (i32, i32, i32) {
    %c0_i32 = arith.constant 0 : i32
    %c0_i32_0 = arith.constant 0 : i32
    return %arg0, %c0_i32, %arg1 : i32, i32, i32
  }
  func.func @transform_1(%arg0: i32, %arg1: i32) -> (i32, i32) {
    %c0_i32 = arith.constant 0 : i32
    %c0_i32_0 = arith.constant 0 : i32
    %c0_i32_1 = arith.constant 0 : i32
    return %c0_i32, %c0_i32_0 : i32, i32
  }
  func.func @transform_2(%arg0: i32, %arg1: i32) -> (i32, i32) {
    %c0_i32 = arith.constant 0 : i32
    %c0_i32_0 = arith.constant 0 : i32
    %c0_i32_1 = arith.constant 0 : i32
    return %c0_i32, %c0_i32_0 : i32, i32
  }
  func.func @transform_3(%arg0: i32, %arg1: i32) -> (i32, i32) {
    %c0_i32 = arith.constant 0 : i32
    %c0_i32_0 = arith.constant 0 : i32
    return %c0_i32, %arg1 : i32, i32
  }
  func.func @transform_4(%arg0: i32, %arg1: i32) -> (i32, i32, i32) {
    %c0_i32 = arith.constant 0 : i32
    %c0_i32_0 = arith.constant 0 : i32
    return %arg0, %c0_i32, %arg1 : i32, i32, i32
  }
  func.func @transform_5(%arg0: i32, %arg1: i32) -> (i32, i32, i32) {
    %c0_i32 = arith.constant 0 : i32
    %c0_i32_0 = arith.constant 0 : i32
    return %arg0, %c0_i32, %arg1 : i32, i32, i32
  }
}

</mosaic_0001>

<bundles_post_ra>
// kernel: tpu_custom_call.1
= control target key start
LH: loop header
LB: loop body
LE: loop exit
PB: predicated region body
PF: predicated region fallthrough
CT: control target
= control target key end

     0   :  { %11 = vsyncpa [#allocation3], 0  ;;  %s1223_s0 = inlined_call_operand.vmem [shape: f32[2,8,128], index: 0, kind: input, shape index: {}]   ;;  %s1224_s1 = inlined_call_operand.vmem [shape: f32[24,8], index: 1, kind: input, shape index: {}]   ;;  %s1225_s2 = inlined_call_operand.vmem [shape: f32[24,8], index: 2, kind: input, shape index: {}]   ;;  %s1226_s3 = inlined_call_operand.vmem [shape: f32[2,128], index: 3, kind: input, shape index: {}]   ;;  %s1227_s4 = inlined_call_operand.hbm [shape: f32[2,24,128], index: 4, kind: output, shape index: {0}]   ;;  %s1228_s5 = inlined_call_operand.hbm [shape: f32[2,24,128], index: 5, kind: output, shape index: {1}]  }
   0x1   :  { %13 = vsyncpa [#allocation3 + $0x1], 0 }
   0x2   :  { %14 = vsyncpa [#allocation5], 0 }
   0x3   :  { %16 = vsyncpa [#allocation5 + $0x1], 0  ;;  %s986_s18 = smov 0   ;;  %s988_s19 = smov 0  }
   0x4   :  { %s990_s20 = smov 0   ;;  %s992_s21 = smov 0  }
   0x5   :  { %s994_s22 = smov 0   ;;  %s996_s23 = smov 0  }
   0x6 LB: > { %s698_s24 = sadd.s32 4294967295, %s942_s23   ;;  %s699_s25 = sadd.s32 4294967294, %s942_s23   ;;  %s942_s23 = sphi %s996_s23, %s22_s23   ;;  %s938_s22 = sphi %s994_s22, %s1235_s22   ;;  %s934_s21 = sphi %s992_s21, %s1234_s21   ;;  %s930_s20 = sphi %s990_s20, %s1233_s20   ;;  %s926_s19 = sphi %s988_s19, %s1232_s19   ;;  %s922_s18 = sphi %s986_s18, %s1231_s18  }
   0x7   : > { %s34_s26 = sadd.s32 1, %s938_s22  ;;  %s139_s27 = sadd.s32 1, %s930_s20 }
   0x8   : > { %p36_p0 = scmp.ge.s32.totalorder %s34_s26, 2  ;;  %p149_p1 = scmp.ne.s32.totalorder %s930_s20, %s926_s19 }
   0x9   : > { %p150_p2 = scmp.eq.s32.totalorder %s698_s24, 1  ;;  %p155_p3 = scmp.ne.s32.totalorder %s926_s19, %s922_s18 }
   0xa   : > { %s1237_s26 = smov (%p36_p0, %s34_s26), 0  ;;  %p156_p5 = scmp.eq.s32.totalorder %s699_s25, 1 }
   0xb   : > { %p1026_p4 = por %p150_p2, %p149_p1  ;;  %s134_s29 = ssub.s32 %s938_s22, %s1237_s26 }
   0xc   : > { %p703_p6 = scmp.ge.s32.totalorder %s942_s23, 1  ;;  %p137_p7 = scmp.eq.s32.totalorder %s134_s29, 0 }
   0xd   : > { %p1033_p8 = por %p156_p5, %p155_p3  ;;  %p225_p9 = scmp.lt.s32.totalorder %s942_s23, 3 }
   0xe   : > { %s1039_s6 = scalar_select %p137_p7, %s930_s20, %s139_s27  }
   0xf   : > { %p226_p10 = pnand %p703_p6, %p225_p9 }
  0x10   : > { %v1044_v0 = vld [vmem:[%s1225_s2] sm:$0xff] (!%p226_p10)  ;;  %p264_p11 = scmp.lt.s32.totalorder (!%p226_p10), %s934_s21, 1  ;;  %v1050_v1 = vld [vmem:[%s1225_s2 + $0x10] sm:$0xff] (!%p226_p10)  ;;  %s944_s11 = smov (!%p226_p10), 127   ;;  %v945_v2 = vmov (!%p226_p10), 0.0   ;;  %vm946_vm0 = vmmov (!%p226_p10), 0  }
  0x11   : > { %229 = sbr.rel (%p226_p10) target bundleno = 308 (0x134), region = 36  ;;  %480 = vrot.lane.b32.xlu0 (!%p226_p10), %v1044_v0, %s944_s11  ;;  %722 = vmatprep.subr.mxu0 (!%p226_p10), %v945_v2  ;;  %v1058_v3 = vld [vmem:[%s1225_s2 + $0x8] sm:$0xff] (!%p226_p10)  ;;  %v947_v4 = vmov (!%p226_p10), 0   ;;  %v276_v5 = vld [vmem:[%s1224_s1] sm:$0xff] (!%p226_p10)  ;;  %vm297_vm1 = vcmask (!%p226_p10), 64512   ;;  %v278_v8 = vld [vmem:[%s1224_s1 + $0x10] sm:$0xff] (!%p226_p10) }
  0x12   : > { %733 = vmatprep.subr.mxu1 (!%p226_p10), %v945_v2  ;;  %724 = vmatprep.mubr.msk.f32.mxu0 (!%p226_p10), %vm946_vm0, %v945_v2  ;;  %v277_v6 = vld [vmem:[%s1224_s1 + $0x8] sm:$0xff] (!%p226_p10)  ;;  %v948_v9 = vmov (!%p226_p10), 1   ;;  %v949_v10 = vmov (!%p226_p10), 2   ;;  %v950_v11 = vmov (!%p226_p10), 4   ;;  %vm496_vm2 = vcmp.gt.f32.partialorder (!%p226_p10), %v1058_v3, 0.5  ;;  %s1107_s10 = sand.u32 (!%p226_p10), 1, %s926_s19  }
  0x13   : > { %727 = vmatprep.mubr.msk.f32.mxu1 (!%p226_p10), %vm946_vm0, %v945_v2  ;;  %484 = vrot.lane.b32.xlu1 (!%p226_p10), %v1050_v1, %s944_s11  ;;  %v499_v12 = vsel (!%p226_p10), %vm496_vm2, 1, %v947_v4  ;;  %v951_v13 = vmov (!%p226_p10), 3   ;;  %vm495_vm3 = vcmp.gt.f32.partialorder (!%p226_p10), %v1044_v0, 0.5  ;;  %vm497_vm4 = vcmp.gt.f32.partialorder (!%p226_p10), %v1050_v1, 0.5  ;;  %s736_s14 = smul.u32 (!%p226_p10), 384, %s934_s21  ;;  %s952_s27 = smov (!%p226_p10), [#allocation2]  }
  0x14   : > { %808 = vset.pattern.permute.xlu1 (!%p226_p10), %v947_v4  ;;  %809 = vset.pattern.permute.xlu0 (!%p226_p10), %v947_v4  ;;  %v498_v14 = vsel (!%p226_p10), %vm495_vm3, 1, %v947_v4  ;;  %v500_v15 = vsel (!%p226_p10), %vm497_vm4, 1, %v947_v4  ;;  %s836_s29 = sshll.u32 (!%p226_p10), %s952_s27, 4  ;;  %s837_s29 = int_to_ptr.vmem [resolvable:$false] %s836_s29 }
  0x15   : > { %482 = vrot.lane.b32.xlu0 (!%p226_p10), %v1058_v3, %s944_s11  ;;  %s735_s11 = smul.u32 (!%p226_p10), 24, %s1107_s10  ;;  %s1124_s17 = scalar_lea.hbm (!%p226_p10), %s1227_s4, %s736_s14 }
  0x16   : > { %s838_s7 = scalar_lea.vmem (!%p226_p10), %s837_s29, 768 }
  0x17   : > { %284 = vperm.xlu1 (!%p226_p10), %808, %v1044_v0  }
  0x18   : > { %s265_s12 = scalar_select %p264_p11, %s934_s21, 1 }
  0x19   : > { %289 = vperm.xlu0 %809, %v1058_v3  }
  0x1a   : > { %s704_s15 = sshll.u32 %s265_s12, 3  ;;  %s256_s12 = scalar_lea.vmem [#allocation2], %s735_s11 }
  0x1b   : > { %s270_s24 = scalar_lea.vmem %s1223_s0, %s704_s15  ;;  %294 = vperm.xlu1 %808, %v1050_v1   ;;  %s557_s13 = sshll.u32 %s256_s12, 4  ;;  %s1117_s13 = int_to_ptr.vmem [resolvable:$true] %s557_s13 }
  0x1c   : > { %v275_v7 = vld [vmem:[%s270_s24] sm:$0xff]  ;;  %s538_s24 = scalar_lea.sflag [#allocation3], %s1107_s10  ;;  %s832_s25 = scalar_lea.vmem %s1117_s13, 384 }
  0x1d   : > { %723 = vmatpush3.msra.mxu0 %v275_v7  ;;  %734 = vmatpush3.msra.mxu1 %v275_v7  ;;  %p833_p12 = scmp.ne.s32.totalorder %s1117_s13, %s832_s25  ;;  %p839_p1 = scmp.lt.s32.totalorder %s1117_s13, %s837_s29 }
  0x1e   : > { %725 = vmatmul.mubr.msk.f32.vlgmr.msra.gmra.mrb[0].mxu0 %vm297_vm1, %v276_v5  ;;  %728 = vmatmul.mubr.msk.f32.vlgmr.msra.gmra.mrb[0].mxu1 %vm297_vm1, %v277_v6  ;;  %p840_p2 = scmp.lt.s32.totalorder %s838_s7, %s832_s25 }
  0x1f   : > { %730 = vmatprep.mubr.msk.f32.mxu1 %vm946_vm0, %v945_v2  ;;  %811 = vset.pattern.permute.xlu0 %v948_v9  ;;  %p834_p13 = pnand %p833_p12, %p1026_p4 }
  0x20   : > { %417 = vperm.xlu0 %811, %v1058_v3   ;;  %810 = vset.pattern.permute.xlu1 %v948_v9  ;;  %p841_p3 = por %p840_p2, %p839_p1 }
  0x21   : > { %413 = vperm.xlu1 %810, %v1044_v0   ;;  %p835_p0 = pneg %p834_p13 }
  0x22   : > { %731 = vmatmul.mubr.msk.f32.gmra.mrb[2].mxu1 %vm297_vm1, %v278_v8 }
  0x23   : > { %p842_p5 = pnand %p841_p3, %p835_p0 }
  0x24   : > { %813 = vset.pattern.permute.xlu0 %v949_v10 }
  0x25   : > { %436 = vperm.xlu0 %813, %v1058_v3   ;;  %421 = vperm.xlu1 %810, %v1050_v1  }
  0x29   : > { %815 = vset.pattern.permute.xlu0 %v950_v11  ;;  %812 = vset.pattern.permute.xlu1 %v949_v10 }
  0x2a   : > { %470 = vperm.xlu0 %815, %v1058_v3   ;;  %432 = vperm.xlu1 %812, %v1044_v0  }
  0x2e   : > { %817 = vset.pattern.permute.xlu0 %v951_v13  ;;  %440 = vperm.xlu1 %812, %v1050_v1  }
  0x2f   : > { %505 = vperm.xlu0 %817, %v499_v12  }
  0x32   : > { %814 = vset.pattern.permute.xlu1 %v950_v11 }
  0x33   : > { %819 = vset.pattern.permute.xlu0 %v948_v9  ;;  %466 = vperm.xlu1 %814, %v1044_v0  }
  0x37   : > { %474 = vperm.xlu1 %814, %v1050_v1  }
  0x3b   : > { %816 = vset.pattern.permute.xlu1 %v951_v13 }
  0x3c   : > { %502 = vperm.xlu1 %816, %v498_v14  }
  0x40   : > { %508 = vperm.xlu1 %816, %v500_v15  }
  0x44   : > { %818 = vset.pattern.permute.xlu1 %v948_v9 }
  0x83   : > { %v481_v16 = vpop.permute.xlu0 %480 }
  0x84   : > { %v489_v17 = vadd.f32 %v481_v16, %v1044_v0 }
  0x85   : > { %v485_v18 = vpop.permute.xlu1 %484 }
  0x86   : > { %vm492_vm5 = vcmp.gt.f32.partialorder %v489_v17, 0.5  ;;  %v491_v19 = vadd.f32 %v485_v18, %v1050_v1 }
  0x87   : > { %v483_v20 = vpop.permute.xlu0 %482  ;;  %v516_v21 = vsel %vm492_vm5, 1, %v947_v4 }
  0x88   : > { %vm494_vm6 = vcmp.gt.f32.partialorder %v491_v19, 0.5  ;;  %v490_v22 = vadd.f32 %v483_v20, %v1058_v3  ;;  %520 = vperm.xlu1 %818, %v516_v21  }
  0x89   : > { %v518_v23 = vsel %vm494_vm6, 1, %v947_v4 }
  0x8a   : > { %vm493_vm7 = vcmp.gt.f32.partialorder %v490_v22, 0.5 }
  0x8b   : > { %v517_v24 = vsel %vm493_vm7, 1, %v947_v4 }
  0x8c   : > { %523 = vperm.xlu0 %819, %v517_v24   ;;  %526 = vperm.xlu1 %818, %v518_v23  }
  0x96   : > { %v285_v25 = vpop.permute.xlu1 %284 }
  0x98   : > { %v290_v30 = vpop.permute.xlu0 %289 }
  0x9a   : > { %v295_v26 = vpop.permute.xlu1 %294 }
  0xa0   : > { %v1102_v27 = vpop.permute.xlu1 %413 }
  0xa4   : > { %v1104_v28 = vpop.permute.xlu1 %421 }
  0xa9   : > { %v1110_v29 = vpop.permute.xlu1 %432 }
  0xad   : > { %v1115_v37 = vpop.permute.xlu1 %440 }
  0xb2   : > { %v1126_v44 = vpop.permute.xlu1 %466 }
  0xf1   : > { %v373_v31 = vpop.f32.mrb[0].mxu0  ;;  %v378_v32 = vpop.f32.mrb[0].mxu1 }
  0xf2   : > { %v374_v33 = vadd.f32 %v373_v31, %v285_v25  ;;  %v379_v34 = vadd.f32 %v378_v32, %v290_v30  ;;  %v729_v35 = vpop.f32.mrb[1].mxu1  ;;  %v726_v36 = vpop.f32.mrb[1].mxu0 }
  0xf4   : > { %387 = vst [vmem:[%s256_s12] sm:$0xff] %v374_v33  ;;  %v708_v38 = vmul.f32 -1.442695, %v374_v33  ;;  %388 = vst [vmem:[%s256_s12 + $0x8] sm:$0xff] %v379_v34  ;;  %v709_v39 = vmul.f32 -1.442695, %v379_v34 }
  0xf5   : > { %v383_v40 = vpop.f32.mrb[2].mxu1 }
  0xf6   : > { %820 = vpow2.f32 %v708_v38  ;;  %v384_v41 = vadd.f32 %v383_v40, %v295_v26  ;;  %v732_v42 = vpop.f32.mrb[3].mxu1 }
  0xf7   : > { %822 = vpow2.f32 %v709_v39 }
  0xf8   : > { %389 = vst [vmem:[%s256_s12 + $0x10] sm:$0xff] %v384_v41  ;;  %v710_v43 = vmul.f32 -1.442695, %v384_v41 }
  0xf9   : > { %845 = shalt.err (!%p842_p5)
}
  0xfa   : > { %s846_s8 = scalar_lea.hbm %s1124_s17, 384  ;;  %s850_s15 = scalar_lea.hbm %s1227_s4, 768 }
  0xfb   : > { %p847_p6 = scmp.ne.s32.totalorder %s1124_s17, %s846_s8  ;;  %p851_p10 = scmp.lt.u32.totalorder %s1124_s17, %s1227_s4 }
  0xfc   : > { %p852_p11 = scmp.lt.u32.totalorder %s850_s15, %s846_s8  ;;  %p854_p13 = scmp.lt.u32.totalorder %s846_s8, %s1124_s17 }
  0xfd   : > { %p848_p7 = pnand %p847_p6, %p1026_p4 }
  0xfe   : > { %p853_p12 = por %p852_p11, %p851_p10 }
  0xff   : > { %p849_p9 = pneg %p848_p7 }
 0x100   : > { %p855_p0 = por %p854_p13, %p853_p12 }
 0x102   : > { %p856_p1 = pnand %p855_p0, %p849_p9 }
 0x104   : > { %859 = shalt.err (!%p856_p1)
}
 0x105   : > { %s953_s25 = smov 128   ;;  %s954_s29 = smov 8   ;;  %824 = vpow2.f32 %v710_v43  ;;  %v418_v45 = vpop.permute.xlu0 %417  ;;  %v424_v46 = vlaneseq  ;;  %v475_v47 = vpop.permute.xlu1 %474  ;;  %v390_v58 = vld [vmem:[%s1226_s3] sm:$0x3] }
 0x106   : > { %738 = dma.vmem_to_hbm [thread:$0]  (%p1026_p4), %s1117_s13, 384, %s1124_s17, %s538_s24, %s953_s25, %s953_s25, %s954_s29   ;;  %v821_v48 = vpop.eup %820 }
 0x107   : > { %v425_v49 = vshrl.u32 %v424_v46, 7  ;;  %v823_v50 = vpop.eup %822  ;;  %v400_v51 = vadd.f32 1.0, %v821_v48  ;;  %s263_s13 = scalar_lea.vmem [#allocation4], %s735_s11  ;;  %s1172_s11 = scalar_lea.hbm %s1228_s5, %s736_s14 }
 0x108   : > { %v401_v53 = vadd.f32 1.0, %v823_v50  ;;  %s574_s17 = sshll.u32 %s263_s13, 4  ;;  %s543_s12 = scalar_lea.sflag [#allocation5], %s1107_s10  ;;  %s1165_s17 = int_to_ptr.vmem [resolvable:$true] %s574_s17 }
 0x109   : > { %v437_v52 = vpop.permute.xlu0 %436  ;;  %826 = vrcp.f32 %v400_v51  ;;  %v426_v55 = vsub.s32 0, %v425_v49  ;;  %v445_v56 = vsub.s32 1, %v425_v49  ;;  %v503_v57 = vpop.permute.xlu1 %502  ;;  %s860_s15 = scalar_lea.vmem %s1165_s17, 384  ;;  %s955_s16 = smov [#allocation4]  }
 0x10a   : > { %828 = vrcp.f32 %v401_v53  ;;  %vm510_vm9 = vcmp.eq.s32.totalorder %v503_v57, 1  ;;  %p861_p2 = scmp.ne.s32.totalorder %s1165_s17, %s860_s15  ;;  %s864_s27 = sshll.u32 %s955_s16, 4  ;;  %s865_s27 = int_to_ptr.vmem [resolvable:$false] %s864_s27 }
 0x10b   : > { %v427_v61 = vrot.slane %v390_v58, %v426_v55  ;;  %v446_v62 = vrot.slane %v390_v58, %v445_v56  ;;  %s866_s7 = scalar_lea.vmem %s865_s27, 768  ;;  %p867_p6 = scmp.lt.s32.totalorder %s1165_s17, %s865_s27 }
 0x10c   : > { %p862_p3 = pnand %p861_p2, %p1026_p4  ;;  %p868_p7 = scmp.lt.s32.totalorder %s866_s7, %s860_s15 }
 0x10d   : > { %v471_v60 = vpop.permute.xlu0 %470  ;;  %v509_v63 = vpop.permute.xlu1 %508  ;;  %v428_v1 = vmul.f32 %v427_v61, %v1102_v27  ;;  %v447_v2 = vmul.f32 %v446_v62, %v1110_v29  ;;  %v429_v3 = vmul.f32 %v427_v61, %v418_v45  ;;  %v448_v4 = vmul.f32 %v446_v62, %v437_v52 }
 0x10e   : > { %v430_v6 = vmul.f32 %v427_v61, %v1104_v28  ;;  %v449_v7 = vmul.f32 %v446_v62, %v1115_v37  ;;  %vm512_vm12 = vcmp.eq.s32.totalorder %v509_v63, 1  ;;  %p863_p5 = pneg %p862_p3  ;;  %p869_p9 = por %p868_p7, %p867_p6 }
 0x10f   : > { %v825_v54 = vpop.eup %824  ;;  %v450_v11 = vadd.f32 %v447_v2, %v428_v1  ;;  %v451_v14 = vadd.f32 %v448_v4, %v429_v3 }
 0x110   : > { %v402_v59 = vadd.f32 1.0, %v825_v54  ;;  %v452_v17 = vadd.f32 %v449_v7, %v430_v6  ;;  %p870_p10 = pnand %p869_p9, %p863_p5 }
 0x111   : > { %v506_v0 = vpop.permute.xlu0 %505  ;;  %v521_v15 = vpop.permute.xlu1 %520 }
 0x112   : > { %830 = vrcp.f32 %v402_v59  ;;  %vm511_vm8 = vcmp.eq.s32.totalorder %v506_v0, 1  ;;  %vm528_vm10 = vcmp.eq.s32.totalorder %v521_v15, 1 }
 0x113   : > { %v827_v5 = vpop.eup %826 }
 0x114   : > { %v829_v8 = vpop.eup %828  ;;  %v409_v9 = vmul.f32 2.0, %v827_v5 }
 0x115   : > { %v410_v10 = vmul.f32 2.0, %v829_v8  ;;  %v524_v20 = vpop.permute.xlu0 %523  ;;  %v527_v34 = vpop.permute.xlu1 %526 }
 0x116   : > { %v711_v12 = vadd.f32 -0.5, %v409_v9  ;;  %v462_v13 = vmul.f32 %v409_v9, %v409_v9  ;;  %vm529_vm11 = vcmp.eq.s32.totalorder %v524_v20, 1  ;;  %vm530_vm13 = vcmp.eq.s32.totalorder %v527_v34, 1 }
 0x117   : > { %v712_v18 = vadd.f32 -0.5, %v410_v10  ;;  %v463_v19 = vmul.f32 %v410_v10, %v410_v10 }
 0x118   : > { %v477_v21 = vmul.f32 %v1126_v44, %v462_v13  ;;  %v456_v23 = vadd.f32 %v711_v12, %v450_v11 }
 0x119   : > { %v457_v24 = vadd.f32 %v712_v18, %v451_v14  ;;  %v478_v25 = vmul.f32 %v471_v60, %v463_v19 }
 0x11a   : > { %v513_v28 = vsel %vm510_vm9, %v477_v21, %v827_v5  ;;  %v459_v29 = vmul.f32 8.0, %v456_v23 }
 0x11b   : > { %v460_v30 = vmul.f32 8.0, %v457_v24  ;;  %v514_v31 = vsel %vm511_vm8, %v478_v25, %v829_v8 }
 0x11c   : > { %v831_v16 = vpop.eup %830  ;;  %v531_v33 = vsel %vm528_vm10, %v459_v29, %v513_v28 }
 0x11d   : > { %v411_v22 = vmul.f32 2.0, %v831_v16  ;;  %534 = vst [vmem:[%s263_s13] sm:$0xff] %v531_v33  ;;  %v532_v36 = vsel %vm529_vm11, %v460_v30, %v514_v31 }
 0x11e   : > { %535 = vst [vmem:[%s263_s13 + $0x8] sm:$0xff] %v532_v36 }
 0x11f   : > { %v713_v26 = vadd.f32 -0.5, %v411_v22  ;;  %v464_v27 = vmul.f32 %v411_v22, %v411_v22 }
 0x121   : > { %v479_v32 = vmul.f32 %v475_v47, %v464_v27  ;;  %v458_v35 = vadd.f32 %v713_v26, %v452_v17 }
 0x123   : > { %v515_v37 = vsel %vm512_vm12, %v479_v32, %v831_v16  ;;  %v461_v38 = vmul.f32 8.0, %v458_v35 }
 0x125   : > { %v533_v39 = vsel %vm530_vm13, %v461_v38, %v515_v37 }
 0x126   : > { %536 = vst [vmem:[%s263_s13 + $0x10] sm:$0xff] %v533_v39 }
 0x127   : > { %873 = shalt.err (!%p870_p10)
}
 0x128   : > { %s874_s21 = scalar_lea.hbm %s1172_s11, 384  ;;  %s878_s13 = scalar_lea.hbm %s1228_s5, 768 }
 0x129   : > { %p875_p11 = scmp.ne.s32.totalorder %s1172_s11, %s874_s21  ;;  %p879_p0 = scmp.lt.u32.totalorder %s1172_s11, %s1228_s5 }
 0x12a   : > { %p880_p1 = scmp.lt.u32.totalorder %s878_s13, %s874_s21  ;;  %p882_p3 = scmp.lt.u32.totalorder %s874_s21, %s1172_s11 }
 0x12b   : > { %p876_p12 = pnand %p875_p11, %p1026_p4 }
 0x12c   : > { %p881_p2 = por %p880_p1, %p879_p0 }
 0x12d   : > { %p877_p13 = pneg %p876_p12 }
 0x12e   : > { %p883_p5 = por %p882_p3, %p881_p2 }
 0x130   : > { %p884_p6 = pnand %p883_p5, %p877_p13 }
 0x132   : > { %887 = shalt.err (!%p884_p6)
}
 0x133   : > { %739 = dma.vmem_to_hbm [thread:$0]  (%p1026_p4), %s1165_s17, 384, %s1172_s11, %s543_s12, %s953_s25, %s953_s25, %s954_s29  }
 0x134 PF: > { %p749_p7 = scmp.ge.s32.totalorder %s942_s23, 2  ;;  %s589_s15 = sand.u32 1, %s922_s18  }
 0x135   : > { %s590_s16 = scalar_lea.sflag [#allocation3], %s589_s15 }
 0x136   : > { %p743_p9 = pnand %p749_p7, %p1033_p8 }
 0x138   : > { %913 = dma.done.wait (!%p743_p9), %s590_s16, 384  }
 0x139   : > { %915 = vsyncadd (!%p743_p9), %s590_s16, 4294966912  ;;  %s599_s28 = scalar_lea.sflag [#allocation5], %s589_s15 }
 0x13a   : > { %917 = dma.done.wait (!%p743_p9), %s599_s28, 384  }
 0x13b   : > { %919 = vsyncadd (!%p743_p9), %s599_s28, 4294966912  ;;  %s22_s23 = sadd.s32 1, %s942_s23   ;;  %s1231_s18 = smov %s926_s19 }
 0x13c   : > { %p19_p10 = scmp.ge.s32.totalorder %s22_s23, 4   ;;  %s1232_s19 = smov %s930_s20 }
 0x13d   : > { %s1233_s20 = smov %s1039_s6  ;;  %s1234_s21 = smov %s938_s22 }
 0x13e   : > { %s1235_s22 = smov %s1237_s26  ;;  %21 = sbr.rel (!%p19_p10) target bundleno = 6 (0x6), region = 91 }
 0x145   :  { %604 = vsyncpa [#allocation3], 1 }
 0x146   :  { %606 = vsyncpa [#allocation3 + $0x1], 1 }
 0x147   :  { %607 = vsyncpa [#allocation5], 1 }
 0x148   :  { %609 = vsyncpa [#allocation5 + $0x1], 1 }

</bundles_post_ra>
